<compile_context>
chip_gen: v7x
topology: tpu7x:2x2x1
jax: 0.10.0
libtpu: 0.0.40
codegen_flags: <defaults>
</compile_context>

<pallas_src>
import math

import jax
import jax.numpy as jnp
from jax import lax
from jax.experimental import pallas as pl
from jax.experimental.pallas import tpu as pltpu


def _attention_kernel(x_ref, wqkv_ref, bqkv_ref, wf_ref, bf_ref, o_ref):
    # x_ref:    (B_blk, C, S) f32   -- NCHW layout with spatial flattened
    # wqkv_ref: (C, 3C)       bf16  -- columns [K | Q*scale | V]  (already W^T)
    # bqkv_ref: (1, 3C)       f32   -- [b_K | b_Q*scale | b_V]
    # wf_ref:   (C, C)        bf16  -- final projection (already W^T)
    # bf_ref:   (1, C)        f32
    # o_ref:    (B_blk, C, S) f32
    b_blk, c, s = x_ref.shape

    x_cs = x_ref[...]                                          # (B, C, S) f32
    # Sequence-major view for the projections (one small XLU transpose).
    x_sc = jnp.swapaxes(x_cs, 1, 2).astype(jnp.bfloat16)       # (B, S, C)
    x2d = x_sc.reshape(b_blk * s, c)                           # free leading-dim merge

    # Fused QKV projection: ONE MXU matmul with M = B*S, N = 3C.
    qkv = lax.dot_general(
        x2d, wqkv_ref[...],
        dimension_numbers=(((1,), (0,)), ((), ())),
        preferred_element_type=jnp.float32)
    qkv = qkv + bqkv_ref[...]                                  # (B*S, 3C)
    qkv = qkv.reshape(b_blk, s, 3 * c)                         # free leading-dim split

    # Lane-aligned slices when C % 128 == 0 (module default C = 128; still
    # correct, merely slower, for other C).
    k = qkv[:, :, 0 * c:1 * c].astype(jnp.bfloat16)            # (B, S, C)
    q = qkv[:, :, 1 * c:2 * c].astype(jnp.bfloat16)
    v = qkv[:, :, 2 * c:3 * c].astype(jnp.bfloat16)

    # Scores (1/sqrt(C) already folded into Q): (B, S_q, S_k), f32 accumulate.
    sc = lax.dot_general(
        q, k, dimension_numbers=(((2,), (2,)), ((0,), (0,))),
        preferred_element_type=jnp.float32)

    # Numerically stable softmax in f32; denominator reciprocal on the EUP.
    m = jnp.max(sc, axis=-1, keepdims=True)
    p = jnp.exp(sc - m)
    p = p * pl.reciprocal(jnp.sum(p, axis=-1, keepdims=True), approx=True)

    # P @ V in the native (no-transpose) orientation: (B, S_q, C).
    pv = lax.dot_general(
        p.astype(jnp.bfloat16), v,
        dimension_numbers=(((2,), (1,)), ((0,), (0,))),
        preferred_element_type=jnp.float32)

    # Final projection on the merged (B*S, C) slab: M = B*S, N = C.
    out2d = lax.dot_general(
        pv.astype(jnp.bfloat16).reshape(b_blk * s, c), wf_ref[...],
        dimension_numbers=(((1,), (0,)), ((), ())),
        preferred_element_type=jnp.float32)
    out2d = out2d + bf_ref[...]                                # (B*S, C)

    # Back to NCHW layout (one small XLU transpose) + residual, single store.
    out_cs = jnp.swapaxes(out2d.reshape(b_blk, s, c), 1, 2)    # (B, C, S)
    o_ref[...] = (out_cs + x_cs).astype(o_ref.dtype)


def prepare_attention_params(params):
    """One-time weight prep (call once, reuse every forward step).

    Fuses K/Q/V, folds the 1/sqrt(C) softmax scale into the Q rows, transposes
    to the canonical (in, out) matmul orientation, and casts matmul operands to
    bf16 -- so attention_forward issues no per-call concat/cast XLA ops."""
    c = params["w1"].shape[0]
    scale = 1.0 / math.sqrt(c)
    wqkv = jnp.concatenate(
        [params["w1"], params["w2"] * scale, params["w3"]], axis=0)   # (3C, C)
    bqkv = jnp.concatenate(
        [params["b1"], params["b2"] * scale, params["b3"]])           # (3C,)
    return {
        "wqkv_t": jnp.asarray(wqkv.T, jnp.bfloat16),                  # (C, 3C)
        "bqkv": jnp.asarray(bqkv.reshape(1, 3 * c), jnp.float32),
        "wf_t": jnp.asarray(params["wf"].T, jnp.bfloat16),            # (C, C)
        "bf": jnp.asarray(params["bf"].reshape(1, c), jnp.float32),
    }


def _pick_batch_block(b, c, s):
    """Batch elements per grid step.

    - capped so the per-step f32 working set fits comfortably in VMEM
      (guards v7x's smaller 64 MiB VMEM when S grows),
    - >= 2 grid steps when b >= 2 so the BlockSpec pipeline overlaps DMA,
    - >= 4 grid steps when b >= 8 so each v7x TensorCore gets >= 2 steps,
      while still growing the block to amortize the ~0.35 us per-step overhead
      on single-core v5e/v6e."""
    if b <= 1:
        return 1
    per_b_bytes = 4 * (11 * c * s + 2 * s * s)   # rough f32 working set / batch elem
    mem_cap = max(1, (12 * 1024 * 1024) // per_b_bytes)
    min_steps = 4 if b >= 8 else 2
    step_cap = max(1, b // min_steps)
    cap = min(mem_cap, step_cap, b)
    for cand in range(cap, 0, -1):
        if b % cand == 0:
            return cand
    return 1


def attention_forward(x, prepped):
    """x: (b, c, h, w) float32; prepped: output of prepare_attention_params."""
    b, c, h, w = x.shape
    s = h * w
    x_cs = x.reshape(b, c, s)                       # free reshape (NCHW layout)

    b_blk = _pick_batch_block(b, c, s)
    grid = (b // b_blk,)

    io_spec = pl.BlockSpec((b_blk, c, s), lambda i: (i, 0, 0))
    # Weight/bias blocks are grid-invariant.  (At much larger C, consider
    # pipeline_mode=pl.Buffered(1) on these to drop their second VMEM buffer.)
    out_cs = pl.pallas_call(
        _attention_kernel,
        out_shape=jax.ShapeDtypeStruct((b, c, s), x.dtype),
        grid_spec=pltpu.PrefetchScalarGridSpec(
            num_scalar_prefetch=0,
            grid=grid,
            in_specs=[
                io_spec,
                pl.BlockSpec((c, 3 * c), lambda i: (0, 0)),
                pl.BlockSpec((1, 3 * c), lambda i: (0, 0)),
                pl.BlockSpec((c, c), lambda i: (0, 0)),
                pl.BlockSpec((1, c), lambda i: (0, 0)),
            ],
            out_specs=pl.BlockSpec((b_blk, c, s), lambda i: (i, 0, 0)),
        ),
        compiler_params=pltpu.CompilerParams(
            dimension_semantics=("parallel",)),
    )(x_cs, prepped["wqkv_t"], prepped["bqkv"], prepped["wf_t"], prepped["bf"])

    return out_cs.reshape(b, c, h, w)               # free reshape back to NCHW


def _init_params(key, ch):
    ks = jax.random.split(key, 8)
    bound = 1.0 / math.sqrt(ch)   # PyTorch nn.Linear default init range
    def u(k, shape):
        return jax.random.uniform(k, shape, jnp.float32, -bound, bound)
    return {
        "w1": u(ks[0], (ch, ch)), "b1": u(ks[1], (ch,)),
        "w2": u(ks[2], (ch, ch)), "b2": u(ks[3], (ch,)),
        "w3": u(ks[4], (ch, ch)), "b3": u(ks[5], (ch,)),
        "wf": u(ks[6], (ch, ch)), "bf": u(ks[7], (ch,)),
    }


def _reference(x, p):
    """Pure-f32 JAX reference matching the PyTorch module."""
    b, c, h, w = x.shape
    s = h * w
    xt = jnp.transpose(x.reshape(b, c, s), (0, 2, 1))
    K = xt @ p["w1"].T + p["b1"]
    Q = xt @ p["w2"].T + p["b2"]
    V = xt @ p["w3"].T + p["b3"]
    sc = jnp.einsum("bqc,bkc->bqk", Q, K) / math.sqrt(c)
    a = jax.nn.softmax(sc, axis=-1) @ V
    a = a @ p["wf"].T + p["bf"]
    return jnp.transpose(a, (0, 2, 1)).reshape(b, c, h, w) + x


if __name__ == "__main__":
    key = jax.random.PRNGKey(0)
    kp, kx1, kx2 = jax.random.split(key, 3)

    ch = 128                                        # module default ch=128
    params = _init_params(kp, ch)
    prepped = prepare_attention_params(params)      # one-time weight prep

    fwd = jax.jit(attention_forward)

    # Primary shape: batch=2, 8x8 feature map (S=64) -> b_blk=1, 2 grid steps.
    x1 = jax.random.normal(kx1, (2, ch, 8, 8), jnp.float32)
    out1 = jax.block_until_ready(fwd(x1, prepped))
    ref1 = _reference(x1, params)
    assert out1.shape == x1.shape
    # Tolerance accounts for bf16 matmul operands (f32 accumulation) and the
    # approximate EUP reciprocal; typical error is ~1e-2 absolute.
    assert jnp.allclose(out1, ref1, atol=5e-2, rtol=5e-2), "mismatch (8x8)"

    # Second shape exercises b_blk=2 (merged M=B*S matmuls + batched dots) and
    # a lane-dense S=256 feature map.
    x2 = jax.random.normal(kx2, (4, ch, 16, 16), jnp.float32)
    out2 = jax.block_until_ready(fwd(x2, prepped))
    ref2 = _reference(x2, params)
    assert out2.shape == x2.shape
    assert jnp.allclose(out2, ref2, atol=5e-2, rtol=5e-2), "mismatch (16x16)"

    print("KERNEL_OK")
</pallas_src>

<mosaic_0001>
module attributes {stable_mosaic.version = 11 : i64} {
  func.func @_attention_kernel(%arg0: i32, %arg1: memref<1x128x64xf32, #tpu.memory_space<vmem>>, %arg2: memref<128x384xbf16, #tpu.memory_space<vmem>>, %arg3: memref<1x384xf32, #tpu.memory_space<vmem>>, %arg4: memref<128x128xbf16, #tpu.memory_space<vmem>>, %arg5: memref<1x128xf32, #tpu.memory_space<vmem>>, %arg6: memref<1x128x64xf32, #tpu.memory_space<vmem>>) attributes {dimension_semantics = [#tpu.dimension_semantics<parallel>], iteration_bounds = array<i64: 2>, scalar_prefetch = 0 : i64, scratch_operands = 0 : i64, tpu.core_type = #tpu.core_type<tc>, window_params = [{transform_indices = @transform_0, window_bounds = array<i64: 1, 128, 64>}, {pipeline_mode = #tpu.pipeline_mode<synchronous>, transform_indices = @transform_1, window_bounds = array<i64: 128, 384>}, {pipeline_mode = #tpu.pipeline_mode<synchronous>, transform_indices = @transform_2, window_bounds = array<i64: 1, 384>}, {pipeline_mode = #tpu.pipeline_mode<synchronous>, transform_indices = @transform_3, window_bounds = array<i64: 128, 128>}, {pipeline_mode = #tpu.pipeline_mode<synchronous>, transform_indices = @transform_4, window_bounds = array<i64: 1, 128>}, {transform_indices = @transform_5, window_bounds = array<i64: 1, 128, 64>}]} {
    %c0 = arith.constant 0 : index
    %c0_0 = arith.constant 0 : index
    %c0_1 = arith.constant 0 : index
    %0 = vector.load %arg1[%c0, %c0_0, %c0_1] : memref<1x128x64xf32, #tpu.memory_space<vmem>>, vector<1x128x64xf32>
    %1 = tpu.transpose %0, [0, 2, 1] : vector<1x128x64xf32> -> vector<1x64x128xf32>
    %2 = arith.truncf %1 : vector<1x64x128xf32> to vector<1x64x128xbf16>
    %3 = vector.shape_cast %2 : vector<1x64x128xbf16> to vector<64x128xbf16>
    %c0_2 = arith.constant 0 : index
    %c0_3 = arith.constant 0 : index
    %4 = vector.load %arg2[%c0_2, %c0_3] : memref<128x384xbf16, #tpu.memory_space<vmem>>, vector<128x384xbf16>
    %cst = arith.constant dense<0.000000e+00> : vector<64x384xf32>
    %5 = tpu.matmul %3, %4, %cst {dimension_numbers = #tpu.dot_dimension_numbers<[1], [0], [0], [1], [0, 0, 1, 1], [], []>} : vector<64x128xbf16>, vector<128x384xbf16>, vector<64x384xf32> -> vector<64x384xf32>
    %c0_4 = arith.constant 0 : index
    %c0_5 = arith.constant 0 : index
    %6 = vector.load %arg3[%c0_4, %c0_5] : memref<1x384xf32, #tpu.memory_space<vmem>>, vector<1x384xf32>
    %7 = vector.broadcast %6 : vector<1x384xf32> to vector<64x384xf32>
    %8 = arith.addf %5, %7 : vector<64x384xf32>
    %9 = vector.shape_cast %8 : vector<64x384xf32> to vector<1x64x384xf32>
    %10 = vector.extract_strided_slice %9 {offsets = [0, 0, 0], sizes = [1, 64, 128], strides = [1, 1, 1]} : vector<1x64x384xf32> to vector<1x64x128xf32>
    %11 = arith.truncf %10 : vector<1x64x128xf32> to vector<1x64x128xbf16>
    %12 = vector.extract_strided_slice %9 {offsets = [0, 0, 128], sizes = [1, 64, 128], strides = [1, 1, 1]} : vector<1x64x384xf32> to vector<1x64x128xf32>
    %13 = arith.truncf %12 : vector<1x64x128xf32> to vector<1x64x128xbf16>
    %14 = vector.extract_strided_slice %9 {offsets = [0, 0, 256], sizes = [1, 64, 128], strides = [1, 1, 1]} : vector<1x64x384xf32> to vector<1x64x128xf32>
    %15 = arith.truncf %14 : vector<1x64x128xf32> to vector<1x64x128xbf16>
    %cst_6 = arith.constant dense<0.000000e+00> : vector<1x64x64xf32>
    %16 = tpu.matmul %13, %11, %cst_6 {dimension_numbers = #tpu.dot_dimension_numbers<[2], [2], [1], [1], [0, 0, 0, 1, 1, 1], [0], [0]>} : vector<1x64x128xbf16>, vector<1x64x128xbf16>, vector<1x64x64xf32> -> vector<1x64x64xf32>
    %cst_7 = arith.constant dense<0xFF800000> : vector<1x64xf32>
    %17 = vector.multi_reduction <maximumf>, %16, %cst_7 [2] : vector<1x64x64xf32> to vector<1x64xf32>
    %18 = vector.shape_cast %17 : vector<1x64xf32> to vector<1x64x1xf32>
    %19 = vector.broadcast %18 : vector<1x64x1xf32> to vector<1x64x64xf32>
    %20 = arith.subf %16, %19 : vector<1x64x64xf32>
    %21 = math.exp %20 : vector<1x64x64xf32>
    %cst_8 = arith.constant dense<0.000000e+00> : vector<1x64xf32>
    %22 = vector.multi_reduction <add>, %21, %cst_8 [2] : vector<1x64x64xf32> to vector<1x64xf32>
    %23 = vector.shape_cast %22 : vector<1x64xf32> to vector<1x64x1xf32>
    %24 = tpu.reciprocal %23 {approx = true} : vector<1x64x1xf32> -> vector<1x64x1xf32>
    %25 = vector.broadcast %24 : vector<1x64x1xf32> to vector<1x64x64xf32>
    %26 = arith.mulf %21, %25 : vector<1x64x64xf32>
    %27 = arith.truncf %26 : vector<1x64x64xf32> to vector<1x64x64xbf16>
    %cst_9 = arith.constant dense<0.000000e+00> : vector<1x64x128xf32>
    %28 = tpu.matmul %27, %15, %cst_9 {dimension_numbers = #tpu.dot_dimension_numbers<[2], [1], [1], [2], [0, 0, 0, 1, 1, 2], [0], [0]>} : vector<1x64x64xbf16>, vector<1x64x128xbf16>, vector<1x64x128xf32> -> vector<1x64x128xf32>
    %29 = arith.truncf %28 : vector<1x64x128xf32> to vector<1x64x128xbf16>
    %30 = vector.shape_cast %29 : vector<1x64x128xbf16> to vector<64x128xbf16>
    %c0_10 = arith.constant 0 : index
    %c0_11 = arith.constant 0 : index
    %31 = vector.load %arg4[%c0_10, %c0_11] : memref<128x128xbf16, #tpu.memory_space<vmem>>, vector<128x128xbf16>
    %cst_12 = arith.constant dense<0.000000e+00> : vector<64x128xf32>
    %32 = tpu.matmul %30, %31, %cst_12 {dimension_numbers = #tpu.dot_dimension_numbers<[1], [0], [0], [1], [0, 0, 1, 1], [], []>} : vector<64x128xbf16>, vector<128x128xbf16>, vector<64x128xf32> -> vector<64x128xf32>
    %c0_13 = arith.constant 0 : index
    %c0_14 = arith.constant 0 : index
    %33 = vector.load %arg5[%c0_13, %c0_14] : memref<1x128xf32, #tpu.memory_space<vmem>>, vector<1x128xf32>
    %34 = vector.broadcast %33 : vector<1x128xf32> to vector<64x128xf32>
    %35 = arith.addf %32, %34 : vector<64x128xf32>
    %36 = vector.shape_cast %35 : vector<64x128xf32> to vector<1x64x128xf32>
    %37 = tpu.transpose %36, [0, 2, 1] : vector<1x64x128xf32> -> vector<1x128x64xf32>
    %38 = arith.addf %37, %0 : vector<1x128x64xf32>
    %c0_15 = arith.constant 0 : index
    %c0_16 = arith.constant 0 : index
    %c0_17 = arith.constant 0 : index
    %39 = vector.load %arg6[%c0_15, %c0_16, %c0_17] : memref<1x128x64xf32, #tpu.memory_space<vmem>>, vector<1x128x64xf32>
    tpu.vector_store %arg6[%c0_15, %c0_16, %c0_17], %38 {strides = array<i32>} : memref<1x128x64xf32, #tpu.memory_space<vmem>>, vector<1x128x64xf32>,
    return
  }
  func.func @transform_0(%arg0: i32) -> (i32, i32, i32) {
    %c0_i32 = arith.constant 0 : i32
    %c0_i32_0 = arith.constant 0 : i32
    %c0_i32_1 = arith.constant 0 : i32
    return %arg0, %c0_i32, %c0_i32_0 : i32, i32, i32
  }
  func.func @transform_1(%arg0: i32) -> (i32, i32) {
    %c0_i32 = arith.constant 0 : i32
    %c0_i32_0 = arith.constant 0 : i32
    %c0_i32_1 = arith.constant 0 : i32
    return %c0_i32, %c0_i32_0 : i32, i32
  }
  func.func @transform_2(%arg0: i32) -> (i32, i32) {
    %c0_i32 = arith.constant 0 : i32
    %c0_i32_0 = arith.constant 0 : i32
    %c0_i32_1 = arith.constant 0 : i32
    return %c0_i32, %c0_i32_0 : i32, i32
  }
  func.func @transform_3(%arg0: i32) -> (i32, i32) {
    %c0_i32 = arith.constant 0 : i32
    %c0_i32_0 = arith.constant 0 : i32
    %c0_i32_1 = arith.constant 0 : i32
    return %c0_i32, %c0_i32_0 : i32, i32
  }
  func.func @transform_4(%arg0: i32) -> (i32, i32) {
    %c0_i32 = arith.constant 0 : i32
    %c0_i32_0 = arith.constant 0 : i32
    %c0_i32_1 = arith.constant 0 : i32
    return %c0_i32, %c0_i32_0 : i32, i32
  }
  func.func @transform_5(%arg0: i32) -> (i32, i32, i32) {
    %c0_i32 = arith.constant 0 : i32
    %c0_i32_0 = arith.constant 0 : i32
    %c0_i32_1 = arith.constant 0 : i32
    return %arg0, %c0_i32, %c0_i32_0 : i32, i32, i32
  }
}

</mosaic_0001>

<bundles_post_ra>
// kernel: attention_forward.1
= control target key start
LH: loop header
LB: loop body
LE: loop exit
PB: predicated region body
PF: predicated region fallthrough
CT: control target
= control target key end

     0   :  { %s1390_s18 = smov 0   ;;  %s1680_s0 = inlined_call_operand.vmem [shape: f32[2,128,64], index: 0, kind: input, shape index: {}]   ;;  %s1681_s1 = inlined_call_operand.vmem [shape: bf16[128,384], index: 1, kind: input, shape index: {}]   ;;  %s1682_s2 = inlined_call_operand.vmem [shape: f32[1,384], index: 2, kind: input, shape index: {}]   ;;  %s1683_s3 = inlined_call_operand.vmem [shape: bf16[128,128], index: 3, kind: input, shape index: {}]   ;;  %s1684_s4 = inlined_call_operand.vmem [shape: f32[1,128], index: 4, kind: input, shape index: {}]   ;;  %s1685_s5 = inlined_call_operand.vmem [shape: f32[2,128,64], index: 5, kind: output, shape index: {}]  }
   0x1 LB: > { %s1099_s19 = sadd.s32 4294967295, %s1357_s18   ;;  %p1103_p0 = scmp.ge.s32.totalorder %s1357_s18, 1  ;;  %s1357_s18 = sphi %s1390_s18, %s15_s18  }
   0x2   : > { %p187_p1 = scmp.lt.s32.totalorder %s1357_s18, 3 }
   0x4   : > { %p188_p2 = pnand %p1103_p0, %p187_p1 }
   0x5   : > { %p215_p3 = scmp.lt.s32.totalorder (!%p188_p2), %s1099_s19, 1  ;;  %v1279_v0 = vld [vmem:[%s1681_s1 + $0x4] ss:$12 sps:$4 sm:$0xff] (!%p188_p2)   ;;  %v1281_v1 = vld [vmem:[%s1681_s1] ss:$12 sps:$4 sm:$0xff] (!%p188_p2)   ;;  %v1359_v14 = vmov (!%p188_p2), 0   ;;  %v312_v53 = vlaneseq (!%p188_p2) }
   0x6   : > { %191 = sbr.rel (%p188_p2) target bundleno = 1568 (0x620), region = 40  ;;  %455 = vmatprep.subr.bf16.mxu0 (!%p188_p2), %v1279_v0  ;;  %v1282_v2 = vld [vmem:[%s1681_s1 + $0x1c] ss:$12 sps:$4 sm:$0xff] (!%p188_p2)   ;;  %v1284_v3 = vld [vmem:[%s1681_s1 + $0x18] ss:$12 sps:$4 sm:$0xff] (!%p188_p2)   ;;  %487 = vmatprep.mubr.bf16.mxu0 (!%p188_p2), %v1359_v14  ;;  %vm670_vm0 = vcmask (!%p188_p2), 523264  }
   0x7   : > { %456 = vmatpush1.bf16.msra.mxu0 (!%p188_p2), %v1281_v1  ;;  %v1285_v4 = vld [vmem:[%s1681_s1 + $0x34] ss:$12 sps:$4 sm:$0xff] (!%p188_p2)   ;;  %v1288_v7 = vld [vmem:[%s1681_s1 + $0x30] ss:$12 sps:$4 sm:$0xff] (!%p188_p2)   ;;  %v1289_v9 = vld [vmem:[%s1681_s1 + $0x4c] ss:$12 sps:$4 sm:$0xff] (!%p188_p2)  }
   0x8   : > { %457 = vmatprep.subr.bf16.mxu0 (!%p188_p2), %v1282_v2  ;;  %v1287_v5 = vld [vmem:[%s1681_s1 + $0x8] ss:$12 sps:$4 sm:$0xff] (!%p188_p2)   ;;  %v1291_v11 = vld [vmem:[%s1681_s1 + $0x20] ss:$12 sps:$4 sm:$0xff] (!%p188_p2)   ;;  %v1293_v13 = vld [vmem:[%s1681_s1 + $0x64] ss:$12 sps:$4 sm:$0xff] (!%p188_p2)  }
   0x9   : > { %1189 = vmatprep.subr.bf16.mxu1 (!%p188_p2), %v1287_v5  ;;  %v1292_v12 = vld [vmem:[%s1681_s1 + $0x48] ss:$12 sps:$4 sm:$0xff] (!%p188_p2)   ;;  %v1295_v16 = vld [vmem:[%s1681_s1 + $0x38] ss:$12 sps:$4 sm:$0xff] (!%p188_p2)   ;;  %v1296_v17 = vld [vmem:[%s1681_s1 + $0x60] ss:$12 sps:$4 sm:$0xff] (!%p188_p2)  }
   0xa   : > { %1190 = vmatpush3.bf16.msra.mxu1 (!%p188_p2), %v1287_v5  ;;  %v1297_v18 = vld [vmem:[%s1681_s1 + $0x7c] ss:$12 sps:$4 sm:$0xff] (!%p188_p2)   ;;  %v1300_v21 = vld [vmem:[%s1681_s1 + $0x78] ss:$12 sps:$4 sm:$0xff] (!%p188_p2)   ;;  %v1301_v22 = vld [vmem:[%s1681_s1 + $0x94] ss:$12 sps:$4 sm:$0xff] (!%p188_p2)  }
   0xb   : > { %458 = vmatpush1.bf16.msra.mxu0 (!%p188_p2), %v1284_v3  ;;  %1191 = vmatprep.subr.bf16.mxu1 (!%p188_p2), %v1291_v11  ;;  %v1299_v19 = vld [vmem:[%s1681_s1 + $0x50] ss:$12 sps:$4 sm:$0xff] (!%p188_p2)   ;;  %v1303_v23 = vld [vmem:[%s1681_s1 + $0x68] ss:$12 sps:$4 sm:$0xff] (!%p188_p2)   ;;  %v1305_v25 = vld [vmem:[%s1681_s1 + $0xac] ss:$12 sps:$4 sm:$0xff] (!%p188_p2)  }
   0xc   : > { %459 = vmatprep.subr.bf16.mxu0 (!%p188_p2), %v1285_v4  ;;  %v1304_v24 = vld [vmem:[%s1681_s1 + $0x90] ss:$12 sps:$4 sm:$0xff] (!%p188_p2)   ;;  %v1307_v27 = vld [vmem:[%s1681_s1 + $0x80] ss:$12 sps:$4 sm:$0xff] (!%p188_p2)   ;;  %v1308_v28 = vld [vmem:[%s1681_s1 + $0xa8] ss:$12 sps:$4 sm:$0xff] (!%p188_p2)  }
   0xd   : > { %s1687_s19 = smov (!%p215_p3, %s1099_s19), 1  ;;  %v1309_v30 = vld [vmem:[%s1681_s1 + $0x98] ss:$12 sps:$4 sm:$0xff]   ;;  %v1310_v32 = vld [vmem:[%s1681_s1 + $0xb0] ss:$12 sps:$4 sm:$0xff]   ;;  %v313_v54 = vshrl.u32 %v312_v53, 7 }
   0xe   : > { %s1147_s30 = sshll.u32 %s1687_s19, 7  ;;  %1192 = vmatpush3.bf16.msra.mxu1 %v1291_v11  ;;  %v310_v56 = vld [vmem:[%s1682_s2] sm:$0x7] }
   0xf   : > { %s1424_s10 = scalar_lea.vmem %s1680_s0, %s1147_s30  ;;  %460 = vmatpush1.bf16.msra.mxu0 %v1288_v7  ;;  %1193 = vmatprep.subr.bf16.mxu1 %v1295_v16  ;;  %v314_v55 = vsub.s32 0, %v313_v54  ;;  %v318_v57 = vsub.s32 1, %v313_v54  ;;  %v322_v2 = vsub.s32 2, %v313_v54 }
  0x10   : > { %v1427_v6 = vld [vmem:[%s1424_s10] sm:$0xff]  ;;  %v1434_v8 = vld [vmem:[%s1424_s10 + $0x8] sm:$0xff]  ;;  %v1441_v10 = vld [vmem:[%s1424_s10 + $0x10] sm:$0xff]  ;;  %461 = vmatprep.subr.bf16.mxu0 %v1289_v9 }
  0x11   : > { %242 = vxpose.xlu0.b32.start [1/16] (narrow) %v1427_v6, 64  ;;  %v1454_v15 = vld [vmem:[%s1424_s10 + $0x18] sm:$0xff]  ;;  %v1471_v20 = vld [vmem:[%s1424_s10 + $0x20] sm:$0xff]  ;;  %v1490_v26 = vld [vmem:[%s1424_s10 + $0x28] sm:$0xff]  ;;  %v1551_v58 = vrot.slane %v310_v56, %v314_v55  ;;  %v1553_v60 = vrot.slane %v310_v56, %v318_v57  ;;  %v323_v9 = vrot.slane %v310_v56, %v322_v2 }
  0x12   : > { %1194 = vmatpush3.bf16.msra.mxu1 %v1295_v16  ;;  %v1500_v29 = vld [vmem:[%s1424_s10 + $0x30] sm:$0xff]  ;;  %v1507_v31 = vld [vmem:[%s1424_s10 + $0x38] sm:$0xff]  ;;  %v1514_v33 = vld [vmem:[%s1424_s10 + $0x40] sm:$0xff] }
  0x13   : > { %462 = vmatpush1.bf16.msra.mxu0 %v1292_v12  ;;  %1195 = vmatprep.subr.bf16.mxu1 %v1299_v19  ;;  %v1518_v34 = vld [vmem:[%s1424_s10 + $0x48] sm:$0xff]  ;;  %v1522_v35 = vld [vmem:[%s1424_s10 + $0x50] sm:$0xff]  ;;  %v1526_v36 = vld [vmem:[%s1424_s10 + $0x58] sm:$0xff] }
  0x14   : > { %463 = vmatprep.subr.bf16.mxu0 %v1293_v13  ;;  %v1530_v37 = vld [vmem:[%s1424_s10 + $0x60] sm:$0xff]  ;;  %v1534_v38 = vld [vmem:[%s1424_s10 + $0x68] sm:$0xff]  ;;  %v1538_v39 = vld [vmem:[%s1424_s10 + $0x70] sm:$0xff] }
  0x15   : > { %243 = vxpose.xlu0.b32.cont [2/16] (narrow) %v1434_v8, 64  ;;  %v1542_v40 = vld [vmem:[%s1424_s10 + $0x78] sm:$0xff]  ;;  %s1627_s10 = scalar_lea.vmem %s1685_s5, %s1147_s30 }
  0x16   : > { %1196 = vmatpush3.bf16.msra.mxu1 %v1299_v19 }
  0x17   : > { %464 = vmatpush1.bf16.msra.mxu0 %v1296_v17  ;;  %1197 = vmatprep.subr.bf16.mxu1 %v1303_v23 }
  0x18   : > { %465 = vmatprep.subr.bf16.mxu0 %v1297_v18 }
  0x19   : > { %244 = vxpose.xlu0.b32.cont [3/16] (narrow) %v1441_v10, 64 }
  0x1a   : > { %1198 = vmatpush3.bf16.msra.mxu1 %v1303_v23 }
  0x1b   : > { %466 = vmatpush1.bf16.msra.mxu0 %v1300_v21  ;;  %1199 = vmatprep.subr.bf16.mxu1 %v1307_v27 }
  0x1c   : > { %467 = vmatprep.subr.bf16.mxu0 %v1301_v22 }
  0x1d   : > { %245 = vxpose.xlu0.b32.cont [4/16] (narrow) %v1454_v15, 64 }
  0x1e   : > { %1200 = vmatpush3.bf16.msra.mxu1 %v1307_v27 }
  0x1f   : > { %468 = vmatpush1.bf16.msra.mxu0 %v1304_v24  ;;  %1201 = vmatprep.subr.bf16.mxu1 %v1309_v30 }
  0x20   : > { %469 = vmatprep.subr.bf16.mxu0 %v1305_v25 }
  0x21   : > { %246 = vxpose.xlu0.b32.cont [5/16] (narrow) %v1471_v20, 64 }
  0x22   : > { %1202 = vmatpush3.bf16.msra.mxu1 %v1309_v30 }
  0x23   : > { %470 = vmatpush1.bf16.msra.mxu0 %v1308_v28  ;;  %1203 = vmatprep.subr.bf16.mxu1 %v1310_v32 }
  0x25   : > { %247 = vxpose.xlu0.b32.cont [6/16] (narrow) %v1490_v26, 64 }
  0x26   : > { %1204 = vmatpush3.bf16.msra.mxu1 %v1310_v32 }
  0x29   : > { %248 = vxpose.xlu0.b32.cont [7/16] (narrow) %v1500_v29, 64 }
  0x2d   : > { %249 = vxpose.xlu0.b32.cont [8/16] (narrow) %v1507_v31, 64 }
  0x31   : > { %250 = vxpose.xlu0.b32.cont [9/16] (narrow) %v1514_v33, 64 }
  0x35   : > { %251 = vxpose.xlu0.b32.cont [10/16] (narrow) %v1518_v34, 64 }
  0x39   : > { %252 = vxpose.xlu0.b32.cont [11/16] (narrow) %v1522_v35, 64 }
  0x3d   : > { %253 = vxpose.xlu0.b32.cont [12/16] (narrow) %v1526_v36, 64 }
  0x41   : > { %254 = vxpose.xlu0.b32.cont [13/16] (narrow) %v1530_v37, 64 }
  0x45   : > { %255 = vxpose.xlu0.b32.cont [14/16] (narrow) %v1534_v38, 64 }
  0x49   : > { %256 = vxpose.xlu0.b32.cont [15/16] (narrow) %v1538_v39, 64 }
  0x4d   : > { %257 = vxpose.xlu0.b32.end [16/16] (narrow) %v1542_v40, 64 }
  0x91   : > { %v258_v41 = vpop.trf.xlu0 }
  0x95   : > { %v259_v42 = vpop.trf.xlu0 }
  0x96   : > { %v274_v43 = vpack.c.bf16 %v259_v42, %v258_v41 }
  0x98   : > { %488 = vmatmul.mubr.bf16.vlgmr.msra.gmra.mrb[0].mxu0 %v274_v43  ;;  %1205 = vmatprep.mubr.bf16.mxu1 %v274_v43 }
  0x99   : > { %v260_v44 = vpop.trf.xlu0  ;;  %497 = vmatprep.mubr.bf16.mxu0 %v1359_v14 }
  0x9d   : > { %v261_v45 = vpop.trf.xlu0 }
  0x9e   : > { %v275_v46 = vpack.c.bf16 %v261_v45, %v260_v44 }
  0xa0   : > { %498 = vmatmul.mubr.bf16.gmra.mrb[4].mxu0 %v275_v46  ;;  %1206 = vmatmul.mubr.bf16.vlgmr.msra.gmra.mrb[0].mxu1 %v275_v46 }
  0xa1   : > { %v262_v47 = vpop.trf.xlu0  ;;  %507 = vmatprep.mubr.bf16.mxu0 %v1359_v14 }
  0xa5   : > { %v263_v48 = vpop.trf.xlu0 }
  0xa6   : > { %v276_v49 = vpack.c.bf16 %v263_v48, %v262_v47 }
  0xa8   : > { %508 = vmatmul.mubr.bf16.gmra.mrb[8].mxu0 %v276_v49  ;;  %1209 = vmatprep.mubr.bf16.mxu1 %v276_v49 }
  0xa9   : > { %v264_v50 = vpop.trf.xlu0  ;;  %517 = vmatprep.mubr.bf16.mxu0 %v1359_v14 }
  0xad   : > { %v265_v51 = vpop.trf.xlu0 }
  0xae   : > { %v277_v52 = vpack.c.bf16 %v265_v51, %v264_v50 }
  0xb0   : > { %518 = vmatmul.mubr.bf16.gmra.mrb[12].mxu0 %v277_v52  ;;  %1210 = vmatmul.mubr.bf16.gmra.mrb[4].mxu1 %v277_v52 }
 0x16b   : > { %v489_v59 = vpop.f32.mrb[0].mxu0 }
 0x16c   : > { %v491_v61 = vpop.f32.mrb[1].mxu0  ;;  %v490_v63 = vadd.f32 %v489_v59, %v1551_v58 }
 0x16d   : > { %v493_v62 = vpop.f32.mrb[2].mxu0  ;;  %v492_v3 = vadd.f32 %v491_v61, %v1553_v60 }
 0x16e   : > { %v494_v0 = vadd.f32 %v493_v62, %v1551_v58  ;;  %v495_v1 = vpop.f32.mrb[3].mxu0 }
 0x16f   : > { %v496_v4 = vadd.f32 %v495_v1, %v1553_v60 }
 0x170   : > { %v593_v5 = vpack.c.bf16 %v494_v0, %v490_v63 }
 0x171   : > { %v597_v7 = vpack.c.bf16 %v496_v4, %v492_v3 }
 0x172   : > { %1213 = vmatprep.subr.bf16.mxu0 %v593_v5 }
 0x173   : > { %v499_v11 = vpop.f32.mrb[4].mxu0  ;;  %v1207_v12 = vpop.f32.mrb[0].mxu1  ;;  %1214 = vmatpush3.bf16.xpose.msra.mxu0 %v593_v5  ;;  %1221 = vmatprep.mubr.bf16.mxu0 %v597_v7 }
 0x174   : > { %v501_v13 = vpop.f32.mrb[5].mxu0  ;;  %v562_v14 = vpop.f32.mrb[1].mxu1  ;;  %v500_v18 = vadd.f32 %v499_v11, %v1551_v58  ;;  %v571_v19 = vadd.f32 %v1207_v12, %v323_v9 }
 0x175   : > { %v503_v16 = vpop.f32.mrb[6].mxu0  ;;  %v1208_v17 = vpop.f32.mrb[2].mxu1  ;;  %v502_v25 = vadd.f32 %v501_v13, %v1553_v60  ;;  %v563_v27 = vadd.f32 %v562_v14, %v323_v9 }
 0x176   : > { %v504_v21 = vadd.f32 %v503_v16, %v1551_v58  ;;  %v574_v22 = vadd.f32 %v1208_v17, %v323_v9  ;;  %v505_v23 = vpop.f32.mrb[7].mxu0  ;;  %v565_v24 = vpop.f32.mrb[3].mxu1 }
 0x177   : > { %v506_v28 = vadd.f32 %v505_v23, %v1553_v60  ;;  %v566_v30 = vadd.f32 %v565_v24, %v323_v9 }
 0x178   : > { %v594_v32 = vpack.c.bf16 %v504_v21, %v500_v18  ;;  %v602_v41 = vpack.c.bf16 %v574_v22, %v571_v19 }
 0x179   : > { %v598_v42 = vpack.c.bf16 %v506_v28, %v502_v25  ;;  %v601_v43 = vpack.c.bf16 %v566_v30, %v563_v27 }
 0x17a   : > { %1215 = vmatprep.subr.bf16.mxu0 %v594_v32 }
 0x17b   : > { %v509_v44 = vpop.f32.mrb[8].mxu0  ;;  %1216 = vmatpush3.bf16.xpose.msra.mxu0 %v594_v32  ;;  %1229 = vmatprep.subr.bf16.mxu1 %v601_v43 }
 0x17c   : > { %v511_v45 = vpop.f32.mrb[9].mxu0  ;;  %1230 = vmatpush3.bf16.msra.mxu1 %v601_v43  ;;  %v510_v47 = vadd.f32 %v509_v44, %v1551_v58 }
 0x17d   : > { %v513_v46 = vpop.f32.mrb[10].mxu0  ;;  %1231 = vmatprep.subr.bf16.mxu1 %v602_v41  ;;  %v512_v50 = vadd.f32 %v511_v45, %v1553_v60 }
 0x17e   : > { %v514_v48 = vadd.f32 %v513_v46, %v1551_v58  ;;  %v515_v49 = vpop.f32.mrb[11].mxu0 }
 0x17f   : > { %v516_v51 = vadd.f32 %v515_v49, %v1553_v60 }
 0x180   : > { %v595_v52 = vpack.c.bf16 %v514_v48, %v510_v47  ;;  %1232 = vmatpush3.bf16.msra.mxu1 %v602_v41 }
 0x181   : > { %v599_v53 = vpack.c.bf16 %v516_v51, %v512_v50 }
 0x182   : > { %1217 = vmatprep.subr.bf16.mxu0 %v595_v52 }
 0x183   : > { %v519_v54 = vpop.f32.mrb[12].mxu0  ;;  %v1211_v55 = vpop.f32.mrb[4].mxu1  ;;  %1218 = vmatpush3.bf16.xpose.msra.mxu0 %v595_v52 }
 0x184   : > { %v521_v56 = vpop.f32.mrb[13].mxu0  ;;  %v578_v57 = vpop.f32.mrb[5].mxu1  ;;  %v520_v62 = vadd.f32 %v519_v54, %v1551_v58  ;;  %v587_v63 = vadd.f32 %v1211_v55, %v323_v9 }
 0x185   : > { %v523_v59 = vpop.f32.mrb[14].mxu0  ;;  %v1212_v61 = vpop.f32.mrb[6].mxu1  ;;  %v522_v4 = vadd.f32 %v521_v56, %v1553_v60  ;;  %v579_v5 = vadd.f32 %v578_v57, %v323_v9 }
 0x186   : > { %v524_v0 = vadd.f32 %v523_v59, %v1551_v58  ;;  %v590_v1 = vadd.f32 %v1212_v61, %v323_v9  ;;  %v525_v2 = vpop.f32.mrb[15].mxu0  ;;  %v581_v3 = vpop.f32.mrb[7].mxu1 }
 0x187   : > { %v526_v7 = vadd.f32 %v525_v2, %v1553_v60  ;;  %v582_v11 = vadd.f32 %v581_v3, %v323_v9 }
 0x188   : > { %v596_v12 = vpack.c.bf16 %v524_v0, %v520_v62  ;;  %v604_v13 = vpack.c.bf16 %v590_v1, %v587_v63 }
 0x189   : > { %v600_v14 = vpack.c.bf16 %v526_v7, %v522_v4  ;;  %v603_v16 = vpack.c.bf16 %v582_v11, %v579_v5 }
 0x18a   : > { %1219 = vmatprep.subr.bf16.mxu0 %v596_v12 }
 0x18b   : > { %1220 = vmatpush3.bf16.xpose.msra.mxu0 %v596_v12  ;;  %1233 = vmatprep.subr.bf16.mxu1 %v603_v16 }
 0x18c   : > { %1234 = vmatpush3.bf16.msra.mxu1 %v603_v16 }
 0x18d   : > { %1235 = vmatprep.subr.bf16.mxu1 %v604_v13 }
 0x190   : > { %1236 = vmatpush3.bf16.msra.mxu1 %v604_v13 }
 0x192   : > { %1222 = vmatmul.mubr.bf16.vlgmr.msra.gmra.mrb[16].mxu0 %v598_v42 }
 0x193   : > { %1225 = vmatprep.mubr.bf16.mxu0 %v599_v53 }
 0x19a   : > { %1226 = vmatmul.mubr.bf16.gmra.mrb[20].mxu0 %v600_v14 }
 0x265   : > { %v1223_v58 = vpop.f32.mrb[16].mxu0 }
 0x266   : > { %v639_v17 = vpop.f32.mrb[17].mxu0  ;;  %v677_v18 = vsel %vm670_vm0, %v1223_v58, -inf }
 0x267   : > { %678 = vmax.xlane.f32.xlu1 %v677_v18  ;;  %v1224_v60 = vpop.f32.mrb[18].mxu0  ;;  %v671_v19 = vsel %vm670_vm0, %v639_v17, -inf }
 0x268   : > { %v642_v9 = vpop.f32.mrb[19].mxu0  ;;  %v680_v23 = vsel %vm670_vm0, %v1224_v60, -inf }
 0x269   : > { %v674_v27 = vsel %vm670_vm0, %v642_v9, -inf }
 0x26b   : > { %672 = vmax.xlane.f32.xlu1 %v671_v19 }
 0x26d   : > { %v1227_v21 = vpop.f32.mrb[20].mxu0 }
 0x26e   : > { %v655_v22 = vpop.f32.mrb[21].mxu0  ;;  %v689_v28 = vsel %vm670_vm0, %v1227_v21, -inf }
 0x26f   : > { %681 = vmax.xlane.f32.xlu1 %v680_v23  ;;  %v1228_v24 = vpop.f32.mrb[22].mxu0  ;;  %v683_v30 = vsel %vm670_vm0, %v655_v22, -inf  ;;  %v1311_v23 = vld [vmem:[%s1683_s3] sm:$0xff]  }
 0x270   : > { %v658_v25 = vpop.f32.mrb[23].mxu0  ;;  %v692_v41 = vsel %vm670_vm0, %v1228_v24, -inf  ;;  %1245 = vmatprep.subr.bf16.mxu1 %v1311_v23 }
 0x271   : > { %v686_v32 = vsel %vm670_vm0, %v658_v25, -inf }
 0x273   : > { %675 = vmax.xlane.f32.xlu1 %v674_v27 }
 0x277   : > { %690 = vmax.xlane.f32.xlu1 %v689_v28 }
 0x27b   : > { %684 = vmax.xlane.f32.xlu1 %v683_v30 }
 0x27f   : > { %687 = vmax.xlane.f32.xlu1 %v686_v32 }
 0x283   : > { %693 = vmax.xlane.f32.xlu1 %v692_v41 }
 0x2f4   : > { %v679_v42 = vpop.xlane.xlu1 %678 }
 0x2f5   : > { %v697_v43 = vsub.f32 %v1223_v58, %v679_v42 }
 0x2f7   : > { %v707_v44 = vmul.f32 1.442695, %v697_v43 }
 0x2f8   : > { %v673_v45 = vpop.xlane.xlu1 %672 }
 0x2f9   : > { %1319 = vpow2.f32 %v707_v44  ;;  %v695_v46 = vsub.f32 %v639_v17, %v673_v45 }
 0x2fb   : > { %v703_v47 = vmul.f32 1.442695, %v695_v46 }
 0x2fc   : > { %v682_v48 = vpop.xlane.xlu1 %681 }
 0x2fd   : > { %1321 = vpow2.f32 %v703_v47  ;;  %v698_v49 = vsub.f32 %v1224_v60, %v682_v48 }
 0x2ff   : > { %v709_v50 = vmul.f32 1.442695, %v698_v49 }
 0x300   : > { %v676_v51 = vpop.xlane.xlu1 %675 }
 0x301   : > { %1323 = vpow2.f32 %v709_v50  ;;  %v696_v52 = vsub.f32 %v642_v9, %v676_v51 }
 0x303   : > { %v1579_v53 = vpop.eup %1319  ;;  %v705_v54 = vmul.f32 1.442695, %v696_v52  ;;  %v1312_v52 = vld [vmem:[%s1683_s3 + $0x8] sm:$0xff]  }
 0x304   : > { %v691_v55 = vpop.xlane.xlu1 %690  ;;  %v725_v56 = vsel %vm670_vm0, %v1579_v53, 0.0 }
 0x305   : > { %1325 = vpow2.f32 %v705_v54  ;;  %v701_v57 = vsub.f32 %v1227_v21, %v691_v55  ;;  %726 = vadd.xlane.f32.xlu1 %v725_v56 }
 0x307   : > { %v1322_v59 = vpop.eup %1321  ;;  %v715_v61 = vmul.f32 1.442695, %v701_v57  ;;  %v1314_v57 = vld [vmem:[%s1683_s3 + $0x18] sm:$0xff]  }
 0x308   : > { %v685_v62 = vpop.xlane.xlu1 %684  ;;  %v719_v63 = vsel %vm670_vm0, %v1322_v59, 0.0 }
 0x309   : > { %1327 = vpow2.f32 %v715_v61  ;;  %v699_v0 = vsub.f32 %v655_v22, %v685_v62  ;;  %720 = vadd.xlane.f32.xlu1 %v719_v63 }
 0x30b   : > { %v1324_v1 = vpop.eup %1323  ;;  %v711_v2 = vmul.f32 1.442695, %v699_v0 }
 0x30c   : > { %v688_v3 = vpop.xlane.xlu1 %687  ;;  %v728_v4 = vsel %vm670_vm0, %v1324_v1, 0.0 }
 0x30d   : > { %1329 = vpow2.f32 %v711_v2  ;;  %v700_v5 = vsub.f32 %v658_v25, %v688_v3  ;;  %729 = vadd.xlane.f32.xlu1 %v728_v4 }
 0x30f   : > { %v1326_v7 = vpop.eup %1325  ;;  %v713_v11 = vmul.f32 1.442695, %v700_v5  ;;  %v1316_v5 = vld [vmem:[%s1683_s3 + $0x28] sm:$0xff]  }
 0x310   : > { %v694_v12 = vpop.xlane.xlu1 %693  ;;  %v722_v13 = vsel %vm670_vm0, %v1326_v7, 0.0 }
 0x311   : > { %1331 = vpow2.f32 %v713_v11  ;;  %v702_v14 = vsub.f32 %v1228_v24, %v694_v12  ;;  %723 = vadd.xlane.f32.xlu1 %v722_v13  ;;  %v1318_v11 = vld [vmem:[%s1683_s3 + $0x38] sm:$0xff]  }
 0x313   : > { %v1328_v16 = vpop.eup %1327  ;;  %v717_v58 = vmul.f32 1.442695, %v702_v14 }
 0x314   : > { %v737_v17 = vsel %vm670_vm0, %v1328_v16, 0.0 }
 0x315   : > { %1333 = vpow2.f32 %v717_v58  ;;  %738 = vadd.xlane.f32.xlu1 %v737_v17 }
 0x317   : > { %v1330_v18 = vpop.eup %1329 }
 0x318   : > { %v731_v60 = vsel %vm670_vm0, %v1330_v18, 0.0 }
 0x319   : > { %732 = vadd.xlane.f32.xlu1 %v731_v60 }
 0x31b   : > { %v1332_v9 = vpop.eup %1331 }
 0x31c   : > { %v734_v19 = vsel %vm670_vm0, %v1332_v9, 0.0 }
 0x31d   : > { %735 = vadd.xlane.f32.xlu1 %v734_v19 }
 0x31f   : > { %v1334_v21 = vpop.eup %1333 }
 0x320   : > { %v740_v22 = vsel %vm670_vm0, %v1334_v21, 0.0 }
 0x321   : > { %741 = vadd.xlane.f32.xlu1 %v740_v22 }
 0x392   : > { %v727_v24 = vpop.xlane.xlu1 %726 }
 0x396   : > { %v721_v25 = vpop.xlane.xlu1 %720 }
 0x39a   : > { %v730_v27 = vpop.xlane.xlu1 %729 }
 0x39b   : > { %1335 = vrcp.f32 %v730_v27 }
 0x39c   : > { %1337 = vrcp.f32 %v721_v25 }
 0x39d   : > { %1339 = vrcp.f32 %v727_v24 }
 0x39e   : > { %v724_v28 = vpop.xlane.xlu1 %723 }
 0x39f   : > { %1341 = vrcp.f32 %v724_v28 }
 0x3a2   : > { %v739_v30 = vpop.xlane.xlu1 %738 }
 0x3a5   : > { %v1336_v32 = vpop.eup %1335 }
 0x3a6   : > { %v733_v41 = vpop.xlane.xlu1 %732  ;;  %v1338_v42 = vpop.eup %1337  ;;  %v754_v45 = vmul.f32 %v1336_v32, %v1324_v1  ;;  %v1315_v1 = vld [vmem:[%s1683_s3 + $0x20] sm:$0xff]  }
 0x3a7   : > { %v1340_v43 = vpop.eup %1339  ;;  %1343 = vrcp.f32 %v733_v41  ;;  %v751_v47 = vmul.f32 %v1338_v42, %v1322_v59 }
 0x3a8   : > { %v753_v49 = vmul.f32 %v1340_v43, %v1579_v53  ;;  %v1313_v53 = vld [vmem:[%s1683_s3 + $0x10] sm:$0xff]  }
 0x3a9   : > { %v1342_v44 = vpop.eup %1341 }
 0x3aa   : > { %v736_v46 = vpop.xlane.xlu1 %735  ;;  %v752_v48 = vmul.f32 %v1342_v44, %v1326_v7  ;;  %v760_v51 = vpack.c.bf16 %v754_v45, %v753_v49  ;;  %v1317_v7 = vld [vmem:[%s1683_s3 + $0x30] sm:$0xff]  }
 0x3ab   : > { %1345 = vrcp.f32 %v736_v46 }
 0x3ac   : > { %v759_v50 = vpack.c.bf16 %v752_v48, %v751_v47  ;;  %1347 = vrcp.f32 %v739_v30 }
 0x3ae   : > { %1237 = vmatprep.mubr.msk.bf16.mxu1 %vm670_vm0, %v759_v50  ;;  %v742_v54 = vpop.xlane.xlu1 %741 }
 0x3af   : > { %1349 = vrcp.f32 %v742_v54  ;;  %1238 = vmatmul.mubr.msk.bf16.vlgmr.msra.gmra.mrb[8].mxu1 %vm670_vm0, %v760_v51 }
 0x3b0   : > { %1246 = vmatpush3.bf16.msra.mxu1 %v1311_v23  ;;  %v1136_v23 = vld [vmem:[%s1684_s4] ss:$0 sm:$0xff] }
 0x3b1   : > { %1247 = vmatprep.subr.bf16.mxu1 %v1312_v52  ;;  %v1344_v55 = vpop.eup %1343 }
 0x3b2   : > { %v755_v59 = vmul.f32 %v1344_v55, %v1330_v18 }
 0x3b4   : > { %1248 = vmatpush3.bf16.msra.mxu1 %v1312_v52 }
 0x3b5   : > { %v1346_v56 = vpop.eup %1345  ;;  %1249 = vmatprep.subr.bf16.mxu1 %v1313_v53 }
 0x3b6   : > { %v756_v61 = vmul.f32 %v1346_v56, %v1332_v9  ;;  %v1348_v62 = vpop.eup %1347 }
 0x3b7   : > { %v757_v2 = vmul.f32 %v1348_v62, %v1328_v16 }
 0x3b8   : > { %v761_v63 = vpack.c.bf16 %v756_v61, %v755_v59  ;;  %1250 = vmatpush3.bf16.msra.mxu1 %v1313_v53 }
 0x3b9   : > { %v1350_v0 = vpop.eup %1349  ;;  %1251 = vmatprep.subr.bf16.mxu1 %v1314_v57 }
 0x3ba   : > { %1241 = vmatprep.mubr.msk.bf16.mxu1 %vm670_vm0, %v761_v63  ;;  %v758_v3 = vmul.f32 %v1350_v0, %v1334_v21 }
 0x3bc   : > { %v762_v4 = vpack.c.bf16 %v758_v3, %v757_v2  ;;  %1252 = vmatpush3.bf16.msra.mxu1 %v1314_v57 }
 0x3bd   : > { %1253 = vmatprep.subr.bf16.mxu1 %v1315_v1 }
 0x3be   : > { %1242 = vmatmul.mubr.msk.bf16.gmra.mrb[12].mxu1 %vm670_vm0, %v762_v4 }
 0x3c0   : > { %1254 = vmatpush3.bf16.msra.mxu1 %v1315_v1 }
 0x3c1   : > { %1255 = vmatprep.subr.bf16.mxu1 %v1316_v5 }
 0x3c4   : > { %1256 = vmatpush3.bf16.msra.mxu1 %v1316_v5 }
 0x3c5   : > { %1257 = vmatprep.subr.bf16.mxu1 %v1317_v7 }
 0x3c8   : > { %1258 = vmatpush3.bf16.msra.mxu1 %v1317_v7 }
 0x3c9   : > { %1259 = vmatprep.subr.bf16.mxu1 %v1318_v11 }
 0x3cc   : > { %1260 = vmatpush3.bf16.msra.mxu1 %v1318_v11 }
 0x482   : > { %v1239_v12 = vpop.f32.mrb[8].mxu1 }
 0x483   : > { %v809_v13 = vpop.f32.mrb[9].mxu1 }
 0x484   : > { %v1240_v14 = vpop.f32.mrb[10].mxu1 }
 0x485   : > { %v841_v16 = vpack.c.bf16 %v1240_v14, %v1239_v12  ;;  %v812_v58 = vpop.f32.mrb[11].mxu1 }
 0x486   : > { %v840_v17 = vpack.c.bf16 %v812_v58, %v809_v13 }
 0x488   : > { %1261 = vmatprep.mubr.bf16.mxu1 %v840_v17 }
 0x489   : > { %1262 = vmatmul.mubr.bf16.vlgmr.msra.gmra.mrb[16].mxu1 %v841_v16 }
 0x491   : > { %v1243_v18 = vpop.f32.mrb[12].mxu1 }
 0x492   : > { %v825_v60 = vpop.f32.mrb[13].mxu1 }
 0x493   : > { %v1244_v9 = vpop.f32.mrb[14].mxu1 }
 0x494   : > { %v843_v19 = vpack.c.bf16 %v1244_v9, %v1243_v18  ;;  %v828_v21 = vpop.f32.mrb[15].mxu1 }
 0x495   : > { %v842_v22 = vpack.c.bf16 %v828_v21, %v825_v60 }
 0x497   : > { %1265 = vmatprep.mubr.bf16.mxu1 %v842_v22 }
 0x498   : > { %1266 = vmatmul.mubr.bf16.gmra.mrb[20].mxu1 %v843_v19 }
 0x55c   : > { %v1263_v24 = vpop.f32.mrb[16].mxu1 }
 0x55d   : > { %v949_v25 = vpop.f32.mrb[17].mxu1  ;;  %v958_v41 = vadd.f32 %v1263_v24, %v1136_v23 }
 0x55e   : > { %v950_v27 = vadd.f32 %v1136_v23, %v949_v25  ;;  %v1264_v28 = vpop.f32.mrb[18].mxu1 }
 0x55f   : > { %v952_v30 = vpop.f32.mrb[19].mxu1  ;;  %v961_v42 = vadd.f32 %v1264_v28, %v1136_v23 }
 0x560   : > { %980 = vxpose.xlu0.b32.start [1/8] (short) %v950_v27, 128  ;;  %v953_v32 = vadd.f32 %v1136_v23, %v952_v30 }
 0x564   : > { %981 = vxpose.xlu0.b32.cont [2/8] (short) %v953_v32, 128 }
 0x568   : > { %982 = vxpose.xlu0.b32.cont [3/8] (short) %v958_v41, 128 }
 0x56b   : > { %v1267_v43 = vpop.f32.mrb[20].mxu1 }
 0x56c   : > { %983 = vxpose.xlu0.b32.cont [4/8] (short) %v961_v42, 128  ;;  %v965_v44 = vpop.f32.mrb[21].mxu1  ;;  %v974_v49 = vadd.f32 %v1267_v43, %v1136_v23 }
 0x56d   : > { %v966_v45 = vadd.f32 %v1136_v23, %v965_v44  ;;  %v1268_v46 = vpop.f32.mrb[22].mxu1 }
 0x56e   : > { %v968_v47 = vpop.f32.mrb[23].mxu1  ;;  %v977_v50 = vadd.f32 %v1268_v46, %v1136_v23 }
 0x56f   : > { %v969_v48 = vadd.f32 %v1136_v23, %v968_v47 }
 0x570   : > { %984 = vxpose.xlu0.b32.cont [5/8] (short) %v966_v45, 128 }
 0x574   : > { %985 = vxpose.xlu0.b32.cont [6/8] (short) %v969_v48, 128 }
 0x578   : > { %986 = vxpose.xlu0.b32.cont [7/8] (short) %v974_v49, 128 }
 0x57c   : > { %987 = vxpose.xlu0.b32.end [8/8] (short) %v977_v50, 128 }
 0x5e0   : > { %v996_v51 = vpop.trf.xlu0 }
 0x5e1   : > { %v1012_v52 = vadd.f32 %v996_v51, %v1427_v6 }
 0x5e3   : > { %1028 = vst.msk [vmem:[%s1627_s10] sm:$0xff] %vm670_vm0, %v1012_v52 }
 0x5e4   : > { %v997_v54 = vpop.trf.xlu0 }
 0x5e5   : > { %v1013_v53 = vadd.f32 %v997_v54, %v1434_v8 }
 0x5e7   : > { %1029 = vst.msk [vmem:[%s1627_s10 + $0x8] sm:$0xff] %vm670_vm0, %v1013_v53 }
 0x5e8   : > { %v998_v55 = vpop.trf.xlu0 }
 0x5e9   : > { %v1014_v56 = vadd.f32 %v998_v55, %v1441_v10 }
 0x5eb   : > { %1030 = vst.msk [vmem:[%s1627_s10 + $0x10] sm:$0xff] %vm670_vm0, %v1014_v56 }
 0x5ec   : > { %v999_v57 = vpop.trf.xlu0 }
 0x5ed   : > { %v1015_v59 = vadd.f32 %v999_v57, %v1454_v15 }
 0x5ef   : > { %1031 = vst.msk [vmem:[%s1627_s10 + $0x18] sm:$0xff] %vm670_vm0, %v1015_v59 }
 0x5f0   : > { %v1000_v6 = vpop.trf.xlu0 }
 0x5f1   : > { %v1016_v61 = vadd.f32 %v1000_v6, %v1471_v20 }
 0x5f3   : > { %1032 = vst.msk [vmem:[%s1627_s10 + $0x20] sm:$0xff] %vm670_vm0, %v1016_v61 }
 0x5f4   : > { %v1001_v8 = vpop.trf.xlu0 }
 0x5f5   : > { %v1017_v62 = vadd.f32 %v1001_v8, %v1490_v26 }
 0x5f7   : > { %1033 = vst.msk [vmem:[%s1627_s10 + $0x28] sm:$0xff] %vm670_vm0, %v1017_v62 }
 0x5f8   : > { %v1002_v10 = vpop.trf.xlu0 }
 0x5f9   : > { %v1018_v63 = vadd.f32 %v1002_v10, %v1500_v29 }
 0x5fb   : > { %1034 = vst.msk [vmem:[%s1627_s10 + $0x30] sm:$0xff] %vm670_vm0, %v1018_v63 }
 0x5fc   : > { %v1003_v15 = vpop.trf.xlu0 }
 0x5fd   : > { %v1019_v0 = vadd.f32 %v1003_v15, %v1507_v31 }
 0x5ff   : > { %1035 = vst.msk [vmem:[%s1627_s10 + $0x38] sm:$0xff] %vm670_vm0, %v1019_v0 }
 0x600   : > { %v1004_v20 = vpop.trf.xlu0 }
 0x601   : > { %v1020_v1 = vadd.f32 %v1004_v20, %v1514_v33 }
 0x603   : > { %1036 = vst.msk [vmem:[%s1627_s10 + $0x40] sm:$0xff] %vm670_vm0, %v1020_v1 }
 0x604   : > { %v1005_v26 = vpop.trf.xlu0 }
 0x605   : > { %v1021_v2 = vadd.f32 %v1005_v26, %v1518_v34 }
 0x607   : > { %1037 = vst.msk [vmem:[%s1627_s10 + $0x48] sm:$0xff] %vm670_vm0, %v1021_v2 }
 0x608   : > { %v1006_v29 = vpop.trf.xlu0 }
 0x609   : > { %v1022_v3 = vadd.f32 %v1006_v29, %v1522_v35 }
 0x60b   : > { %1038 = vst.msk [vmem:[%s1627_s10 + $0x50] sm:$0xff] %vm670_vm0, %v1022_v3 }
 0x60c   : > { %v1007_v31 = vpop.trf.xlu0 }
 0x60d   : > { %v1023_v4 = vadd.f32 %v1007_v31, %v1526_v36 }
 0x60f   : > { %1039 = vst.msk [vmem:[%s1627_s10 + $0x58] sm:$0xff] %vm670_vm0, %v1023_v4 }
 0x610   : > { %v1008_v33 = vpop.trf.xlu0 }
 0x611   : > { %v1024_v5 = vadd.f32 %v1008_v33, %v1530_v37 }
 0x613   : > { %1040 = vst.msk [vmem:[%s1627_s10 + $0x60] sm:$0xff] %vm670_vm0, %v1024_v5 }
 0x614   : > { %v1009_v34 = vpop.trf.xlu0 }
 0x615   : > { %v1025_v7 = vadd.f32 %v1009_v34, %v1534_v38 }
 0x617   : > { %1041 = vst.msk [vmem:[%s1627_s10 + $0x68] sm:$0xff] %vm670_vm0, %v1025_v7 }
 0x618   : > { %v1010_v11 = vpop.trf.xlu0 }
 0x619   : > { %v1026_v35 = vadd.f32 %v1010_v11, %v1538_v39 }
 0x61b   : > { %1042 = vst.msk [vmem:[%s1627_s10 + $0x70] sm:$0xff] %vm670_vm0, %v1026_v35 }
 0x61c   : > { %v1011_v12 = vpop.trf.xlu0 }
 0x61d   : > { %v1027_v36 = vadd.f32 %v1011_v12, %v1542_v40 }
 0x61f   : > { %1043 = vst.msk [vmem:[%s1627_s10 + $0x78] sm:$0xff] %vm670_vm0, %v1027_v36 }
 0x620 PF: > { %s15_s18 = sadd.s32 1, %s1357_s18  }
 0x621   : > { %p12_p4 = scmp.ge.s32.totalorder %s15_s18, 4  }
 0x623   :  { %14 = sbr.rel (!%p12_p4) target bundleno = 1 (0x1), region = 70 }

</bundles_post_ra>
